<compile_context>
chip_gen: v7x
topology: tpu7x:2x2x1
jax: 0.10.0
libtpu: 0.0.40
codegen_flags: <defaults>
</compile_context>

<pallas_src>
import functools

import jax
import jax.numpy as jnp
from jax.experimental import pallas as pl
from jax.experimental.pallas import tpu as pltpu

_SMOOTH = 1.0


def _round_down(x, m):
    return (x // m) * m


# ---------------------------------------------------------------------------
# Kernel bodies (statics bound via functools.partial).  Both accumulate
# directly into the resident output blocks, initialized at feature step 0.
# ---------------------------------------------------------------------------


def _dense_dice_kernel(x_ref, sum_ref, inter_ref, *, tk, d128, need_mask):
    """x block: (bn, tk, 128) chunks; outputs: (bn, 1, 128) lane-folded partials."""
    t = pl.program_id(1)

    @pl.when(t == 0)
    def _():
        sum_ref[...] = jnp.zeros_like(sum_ref)
        inter_ref[...] = jnp.zeros_like(inter_ref)

    x = x_ref[...].astype(jnp.float32)
    # sigmoid(x) == 0.5 * tanh(0.5 * x) + 0.5  -> one EUP transcendental/elem.
    p = 0.5 * jnp.tanh(0.5 * x) + 0.5
    if need_mask:
        # Ragged tail of the chunk axis: zero chunks >= d128 so garbage read
        # by the partial edge block never reaches the sums.
        chunk = t * tk + jax.lax.broadcasted_iota(jnp.int32, x.shape, 1)
        p = jnp.where(chunk < d128, p, 0.0)

    # Reduce over the sublane-chunk axis only: ~(tk/8) VPU vreg-adds per row
    # per block.  The 128->1 lane reduce happens once in the wrapper.
    sum_ref[...] += jnp.sum(p, axis=1, keepdims=True)
    inter_ref[...] += jnp.sum(p * p, axis=1, keepdims=True)


def _flat_dice_kernel(x_ref, sum_ref, inter_ref, *, td, d, need_mask):
    """Fallback: x block (bn, td); outputs (bn, 1) per-row partials."""
    t = pl.program_id(1)

    @pl.when(t == 0)
    def _():
        sum_ref[...] = jnp.zeros_like(sum_ref)
        inter_ref[...] = jnp.zeros_like(inter_ref)

    x = x_ref[...].astype(jnp.float32)
    p = 0.5 * jnp.tanh(0.5 * x) + 0.5
    if need_mask:
        col = t * td + jax.lax.broadcasted_iota(jnp.int32, x.shape, 1)
        p = jnp.where(col < d, p, 0.0)

    sum_ref[...] += jnp.sum(p, axis=1, keepdims=True)
    inter_ref[...] += jnp.sum(p * p, axis=1, keepdims=True)


# ---------------------------------------------------------------------------
# Wrappers: pick layout + tile sizes, launch, and return per-row (sum, sum(p*p)).
# ---------------------------------------------------------------------------


def _row_sums_dense(x, n, d, max_block_bytes):
    """D % 128 == 0 and D >= 1024: sublane-dense chunked layout (any N)."""
    itemsize = jnp.dtype(x.dtype).itemsize
    d128 = d // 128
    chunk_bytes = 128 * itemsize
    # chunks per block: multiple of 8, capped by the byte budget.
    tk = min(max(8, _round_down(max_block_bytes // chunk_bytes, 8)),
             _round_down(d128, 8))
    # rows per block: fill the remaining budget, bounded by N.
    bn = max(1, min(n, max_block_bytes // (tk * chunk_bytes)))
    grid = (pl.cdiv(n, bn), pl.cdiv(d128, tk))
    need_mask = (d128 % tk) != 0

    x3 = x.reshape(n, d128, 128)  # free row-major split of the last dim
    kernel = functools.partial(_dense_dice_kernel, tk=tk, d128=d128,
                               need_mask=need_mask)
    sums, inters = pl.pallas_call(
        kernel,
        out_shape=(jax.ShapeDtypeStruct((n, 1, 128), jnp.float32),
                   jax.ShapeDtypeStruct((n, 1, 128), jnp.float32)),
        grid_spec=pltpu.PrefetchScalarGridSpec(
            num_scalar_prefetch=0,
            grid=grid,
            in_specs=[pl.BlockSpec((bn, tk, 128), lambda b, t: (b, t, 0))],
            out_specs=[pl.BlockSpec((bn, 1, 128), lambda b, t: (b, 0, 0)),
                       pl.BlockSpec((bn, 1, 128), lambda b, t: (b, 0, 0))],
        ),
        compiler_params=pltpu.CompilerParams(
            dimension_semantics=("parallel", "arbitrary"),
            vmem_limit_bytes=32 << 20,
        ),
    )(x3)
    return jnp.sum(sums, axis=(1, 2)), jnp.sum(inters, axis=(1, 2))


def _row_sums_flat(x, n, d, max_block_bytes):
    """Generic path for ragged / tiny feature dims (2D (bn, td) blocks)."""
    itemsize = jnp.dtype(x.dtype).itemsize
    bn0 = n if n < 8 else 8
    td_cap = max(128, _round_down(max_block_bytes // (bn0 * itemsize), 128))
    td = d if d <= td_cap else td_cap          # multiple of 128, or full dim
    need_mask = (d % td) != 0
    if n < 8:
        bn = n                                  # block dim == full batch dim
    else:
        bn = max(8, _round_down(max_block_bytes // (td * itemsize), 8))
        bn = min(bn, _round_down(n, 8))
    grid = (pl.cdiv(n, bn), pl.cdiv(d, td))

    kernel = functools.partial(_flat_dice_kernel, td=td, d=d,
                               need_mask=need_mask)
    sums, inters = pl.pallas_call(
        kernel,
        out_shape=(jax.ShapeDtypeStruct((n, 1), jnp.float32),
                   jax.ShapeDtypeStruct((n, 1), jnp.float32)),
        grid_spec=pltpu.PrefetchScalarGridSpec(
            num_scalar_prefetch=0,
            grid=grid,
            in_specs=[pl.BlockSpec((bn, td), lambda b, t: (b, t))],
            out_specs=[pl.BlockSpec((bn, 1), lambda b, t: (b, 0)),
                       pl.BlockSpec((bn, 1), lambda b, t: (b, 0))],
        ),
        compiler_params=pltpu.CompilerParams(
            dimension_semantics=("parallel", "arbitrary"),
            vmem_limit_bytes=32 << 20,
        ),
    )(x)
    return sums[:, 0], inters[:, 0]


def soft_dice_loss(logits, targets=None, *, max_block_bytes=2 << 20):
    """logits, targets: (N, C, H, W) (any trailing dims). Returns scalar f32."""
    n = int(logits.shape[0])
    d = 1
    for s in logits.shape[1:]:
        d *= int(s)
    # targets accepted for PyTorch API parity; unused by the original forward
    # (m2 = probs), so they are never passed to / DMA'd by the kernel.
    del targets

    x = logits.reshape(n, d)  # free flatten; keeps input dtype (bf16 stays bf16)

    if d % 128 == 0 and d >= 1024:
        psum, inter = _row_sums_dense(x, n, d, max_block_bytes)
    else:
        # NOTE: for n < 8 this layout under-fills sublanes; only reached when
        # the feature dim is tiny or not 128-aligned.
        psum, inter = _row_sums_flat(x, n, d, max_block_bytes)

    # m1 == m2 == probs  =>  m1.sum + m2.sum == 2 * psum, intersection == sum(p*p)
    score = 2.0 * (inter + _SMOOTH) / (2.0 * psum + _SMOOTH)
    return 1.0 - jnp.sum(score) / n


def soft_dice_loss_ref(logits, targets=None):
    """Pure-JAX reference (same literal semantics as the PyTorch source)."""
    n = logits.shape[0]
    probs = jax.nn.sigmoid(logits.astype(jnp.float32)).reshape(n, -1)
    m1 = probs
    m2 = probs
    inter = jnp.sum(m1 * m2, axis=1)
    score = 2.0 * (inter + _SMOOTH) / (jnp.sum(m1, axis=1) + jnp.sum(m2, axis=1) + _SMOOTH)
    return 1.0 - jnp.sum(score) / n


if __name__ == "__main__":
    key = jax.random.PRNGKey(0)
    k1, k2, k3, k4 = jax.random.split(key, 4)

    # Demo shape (dense, sublane-packed path: D = 4*16*16 = 1024).
    N, C, H, W = 2, 4, 16, 16
    logits = jax.random.normal(k1, (N, C, H, W), dtype=jnp.float32)
    targets = (jax.random.uniform(k2, (N, C, H, W)) > 0.5).astype(jnp.float32)
    loss = jax.block_until_ready(soft_dice_loss(logits, targets))
    ref = soft_dice_loss_ref(logits, targets)
    assert jnp.allclose(loss, ref, atol=1e-5, rtol=1e-5), (loss, ref)

    # Ragged-D fallback path (D = 105, N = 9 exercises batch tiling).
    logits2 = jax.random.normal(k3, (9, 3, 5, 7), dtype=jnp.float32)
    loss2 = jax.block_until_ready(soft_dice_loss(logits2))
    ref2 = soft_dice_loss_ref(logits2)
    assert jnp.allclose(loss2, ref2, atol=1e-5, rtol=1e-5), (loss2, ref2)

    # Dense path with a ragged chunk tail (D = 1152 -> 9 chunks, tile = 8).
    logits3 = jax.random.normal(k4, (10, 3, 8, 48), dtype=jnp.float32)
    loss3 = jax.block_until_ready(soft_dice_loss(logits3))
    ref3 = soft_dice_loss_ref(logits3)
    assert jnp.allclose(loss3, ref3, atol=1e-5, rtol=1e-5), (loss3, ref3)

    print("KERNEL_OK")
</pallas_src>

<mosaic_0001>
module attributes {stable_mosaic.version = 11 : i64} {
  func.func @_dense_dice_kernel(%arg0: i32, %arg1: i32, %arg2: memref<2x8x128xf32, #tpu.memory_space<vmem>>, %arg3: memref<2x1x128xf32, #tpu.memory_space<vmem>>, %arg4: memref<2x1x128xf32, #tpu.memory_space<vmem>>) attributes {dimension_semantics = [#tpu.dimension_semantics<parallel>, #tpu.dimension_semantics<arbitrary>], iteration_bounds = array<i64: 1, 1>, scalar_prefetch = 0 : i64, scratch_operands = 0 : i64, tpu.core_type = #tpu.core_type<tc>, window_params = [{transform_indices = @transform_0, window_bounds = array<i64: 2, 8, 128>}, {transform_indices = @transform_1, window_bounds = array<i64: 2, 1, 128>}, {transform_indices = @transform_2, window_bounds = array<i64: 2, 1, 128>}]} {
    %c0_i32 = arith.constant 0 : i32
    %0 = arith.cmpi eq, %arg1, %c0_i32 : i32
    %1 = arith.extui %0 : i1 to i32
    %c0_i32_0 = arith.constant 0 : i32
    %2 = arith.cmpi ne, %1, %c0_i32_0 : i32
    scf.if %2 {
      %cst_19 = arith.constant 0.000000e+00 : f32
      %22 = vector.broadcast %cst_19 : f32 to vector<2x1x128xf32>
      %c0_20 = arith.constant 0 : index
      %c0_21 = arith.constant 0 : index
      %c0_22 = arith.constant 0 : index
      %23 = vector.load %arg3[%c0_20, %c0_21, %c0_22] : memref<2x1x128xf32, #tpu.memory_space<vmem>>, vector<2x1x128xf32>
      tpu.vector_store %arg3[%c0_20, %c0_21, %c0_22], %22 {strides = array<i32>} : memref<2x1x128xf32, #tpu.memory_space<vmem>>, vector<2x1x128xf32>,
      %cst_23 = arith.constant 0.000000e+00 : f32
      %24 = vector.broadcast %cst_23 : f32 to vector<2x1x128xf32>
      %c0_24 = arith.constant 0 : index
      %c0_25 = arith.constant 0 : index
      %c0_26 = arith.constant 0 : index
      %25 = vector.load %arg4[%c0_24, %c0_25, %c0_26] : memref<2x1x128xf32, #tpu.memory_space<vmem>>, vector<2x1x128xf32>
      tpu.vector_store %arg4[%c0_24, %c0_25, %c0_26], %24 {strides = array<i32>} : memref<2x1x128xf32, #tpu.memory_space<vmem>>, vector<2x1x128xf32>,
    } else {
    }
    %c0 = arith.constant 0 : index
    %c0_1 = arith.constant 0 : index
    %c0_2 = arith.constant 0 : index
    %3 = vector.load %arg2[%c0, %c0_1, %c0_2] : memref<2x8x128xf32, #tpu.memory_space<vmem>>, vector<2x8x128xf32>
    %cst = arith.constant 5.000000e-01 : f32
    %4 = vector.broadcast %cst : f32 to vector<2x8x128xf32>
    %5 = arith.mulf %4, %3 : vector<2x8x128xf32>
    %6 = math.tanh %5 : vector<2x8x128xf32>
    %cst_3 = arith.constant 5.000000e-01 : f32
    %7 = vector.broadcast %cst_3 : f32 to vector<2x8x128xf32>
    %8 = arith.mulf %7, %6 : vector<2x8x128xf32>
    %cst_4 = arith.constant 5.000000e-01 : f32
    %9 = vector.broadcast %cst_4 : f32 to vector<2x8x128xf32>
    %10 = arith.addf %8, %9 : vector<2x8x128xf32>
    %c0_5 = arith.constant 0 : index
    %c0_6 = arith.constant 0 : index
    %c0_7 = arith.constant 0 : index
    %11 = vector.load %arg3[%c0_5, %c0_6, %c0_7] : memref<2x1x128xf32, #tpu.memory_space<vmem>>, vector<2x1x128xf32>
    %cst_8 = arith.constant dense<0.000000e+00> : vector<2x128xf32>
    %12 = vector.multi_reduction <add>, %10, %cst_8 [1] : vector<2x8x128xf32> to vector<2x128xf32>
    %13 = vector.shape_cast %12 : vector<2x128xf32> to vector<2x1x128xf32>
    %14 = arith.addf %11, %13 : vector<2x1x128xf32>
    %c0_9 = arith.constant 0 : index
    %c0_10 = arith.constant 0 : index
    %c0_11 = arith.constant 0 : index
    %15 = vector.load %arg3[%c0_9, %c0_10, %c0_11] : memref<2x1x128xf32, #tpu.memory_space<vmem>>, vector<2x1x128xf32>
    tpu.vector_store %arg3[%c0_9, %c0_10, %c0_11], %14 {strides = array<i32>} : memref<2x1x128xf32, #tpu.memory_space<vmem>>, vector<2x1x128xf32>,
    %c0_12 = arith.constant 0 : index
    %c0_13 = arith.constant 0 : index
    %c0_14 = arith.constant 0 : index
    %16 = vector.load %arg4[%c0_12, %c0_13, %c0_14] : memref<2x1x128xf32, #tpu.memory_space<vmem>>, vector<2x1x128xf32>
    %17 = arith.mulf %10, %10 : vector<2x8x128xf32>
    %cst_15 = arith.constant dense<0.000000e+00> : vector<2x128xf32>
    %18 = vector.multi_reduction <add>, %17, %cst_15 [1] : vector<2x8x128xf32> to vector<2x128xf32>
    %19 = vector.shape_cast %18 : vector<2x128xf32> to vector<2x1x128xf32>
    %20 = arith.addf %16, %19 : vector<2x1x128xf32>
    %c0_16 = arith.constant 0 : index
    %c0_17 = arith.constant 0 : index
    %c0_18 = arith.constant 0 : index
    %21 = vector.load %arg4[%c0_16, %c0_17, %c0_18] : memref<2x1x128xf32, #tpu.memory_space<vmem>>, vector<2x1x128xf32>
    tpu.vector_store %arg4[%c0_16, %c0_17, %c0_18], %20 {strides = array<i32>} : memref<2x1x128xf32, #tpu.memory_space<vmem>>, vector<2x1x128xf32>,
    return
  }
  func.func @transform_0(%arg0: i32, %arg1: i32) -> (i32, i32, i32) {
    %c0_i32 = arith.constant 0 : i32
    %c0_i32_0 = arith.constant 0 : i32
    return %arg0, %arg1, %c0_i32 : i32, i32, i32
  }
  func.func @transform_1(%arg0: i32, %arg1: i32) -> (i32, i32, i32) {
    %c0_i32 = arith.constant 0 : i32
    %c0_i32_0 = arith.constant 0 : i32
    %c0_i32_1 = arith.constant 0 : i32
    return %arg0, %c0_i32, %c0_i32_0 : i32, i32, i32
  }
  func.func @transform_2(%arg0: i32, %arg1: i32) -> (i32, i32, i32) {
    %c0_i32 = arith.constant 0 : i32
    %c0_i32_0 = arith.constant 0 : i32
    %c0_i32_1 = arith.constant 0 : i32
    return %arg0, %c0_i32, %c0_i32_0 : i32, i32, i32
  }
}

</mosaic_0001>

<bundles_post_ra>
// kernel: tpu_custom_call.1
= control target key start
LH: loop header
LB: loop body
LE: loop exit
PB: predicated region body
PF: predicated region fallthrough
CT: control target
= control target key end

     0   :  { %8 = vsyncpa [#allocation3], 0  ;;  %s265_s0 = inlined_call_operand.hbm [shape: f32[2,8,128], index: 0, kind: input, shape index: {}]   ;;  %s266_s1 = inlined_call_operand.hbm [shape: f32[2,1,128], index: 1, kind: output, shape index: {0}]   ;;  %s267_s2 = inlined_call_operand.hbm [shape: f32[2,1,128], index: 2, kind: output, shape index: {1}]  }
   0x1   :  { %9 = vsyncpa [#allocation4], 0 }
   0x2   :  { %10 = vsyncpa [#allocation7], 0  ;;  %s199_s9 = smov [#allocation2]   ;;  %s127_s13 = scalar_lea.hbm %s265_s0, 256 }
   0x3   :  { %s16_s10 = sshll.u32 %s199_s9, 4  ;;  %p128_p0 = scmp.ne.s32.totalorder %s265_s0, %s127_s13  ;;  %s17_s10 = int_to_ptr.vmem [resolvable:$true] %s16_s10 }
   0x4   :  { %p131_p1 = scmp.lt.u32.totalorder %s127_s13, %s265_s0 }
   0x6   :  { %p133_p2 = pnand %p131_p1, %p128_p0 }
   0x8   :  { %136 = shalt.err (!%p133_p2)
}
   0x9   :  { %s137_s18 = scalar_lea.vmem %s17_s10, 256  ;;  %p142_p4 = scmp.lt.s32.totalorder %s17_s10, %s17_s10 }
   0xa   :  { %p138_p3 = scmp.ne.s32.totalorder %s17_s10, %s137_s18  ;;  %p143_p5 = scmp.lt.s32.totalorder %s137_s18, %s137_s18 }
   0xc   :  { %p144_p6 = por %p143_p5, %p142_p4 }
   0xe   :  { %p145_p7 = pnand %p144_p6, %p138_p3 }
  0x10   :  { %148 = shalt.err (!%p145_p7)
}
  0x11   :  { %s200_s19 = smov 128   ;;  %s201_s20 = smov 8  }
  0x12   :  { %22 = dma.hbm_to_vmem [thread:$0]  %s265_s0, 256, %s17_s10, [#allocation3], %s200_s19, %s200_s19, %s201_s20  }
  0x13   :  { %193 = dma.done.wait [#allocation3], 256  }
  0x14   :  { %194 = vsyncadd [#allocation3], 4294967040  ;;  %v202_v0 = vmov 0.0   ;;  %v34_v1 = vld [vmem:[#allocation2] sm:$0xff]  ;;  %v35_v2 = vld [vmem:[#allocation2 + $0x8] sm:$0xff]  ;;  %s203_s0 = smov [#allocation5]  }
  0x15   :  { %30 = vst [vmem:[#allocation5] sm:$0x1] %v202_v0  ;;  %31 = vst [vmem:[#allocation5 + $0x1] sm:$0x1] %v202_v0  ;;  %v36_v3 = vmul.f32 0.5, %v34_v1  ;;  %v37_v4 = vmul.f32 0.5, %v35_v2 }
  0x16   :  { %32 = vst [vmem:[#allocation6] sm:$0x1] %v202_v0  ;;  %33 = vst [vmem:[#allocation6 + $0x1] sm:$0x1] %v202_v0  ;;  %s87_s23 = sshll.u32 %s203_s0, 4  ;;  %s204_s24 = smov [#allocation6]   ;;  %s88_s23 = int_to_ptr.vmem [resolvable:$true] %s87_s23 }
  0x17   :  { %123 = vtanh.f32 %v36_v3  ;;  %s99_s25 = sshll.u32 %s204_s24, 4  ;;  %s149_s26 = scalar_lea.vmem %s88_s23, 32  ;;  %s234_s25 = int_to_ptr.vmem [resolvable:$true] %s99_s25 }
  0x18   :  { %125 = vtanh.f32 %v37_v4  ;;  %p150_p8 = scmp.ne.s32.totalorder %s88_s23, %s149_s26  ;;  %p154_p9 = scmp.lt.s32.totalorder %s88_s23, %s88_s23 }
  0x19   :  { %p155_p10 = scmp.lt.s32.totalorder %s149_s26, %s149_s26 }
  0x1b   :  { %p156_p11 = por %p155_p10, %p154_p9 }
  0x1c   :  { %v44_v29 = vld [vmem:[#allocation5] sm:$0x1]  ;;  %v45_v33 = vld [vmem:[#allocation5 + $0x1] sm:$0x1] }
  0x1d   :  { %v62_v36 = vld [vmem:[#allocation6] sm:$0x1]  ;;  %v63_v40 = vld [vmem:[#allocation6 + $0x1] sm:$0x1]  ;;  %p157_p12 = pnand %p156_p11, %p150_p8 }
  0x21   :  { %v124_v5 = vpop.eup %123 }
  0x22   :  { %v126_v6 = vpop.eup %125  ;;  %v40_v7 = vmul.f32 0.5, %v124_v5 }
  0x23   :  { %v41_v8 = vmul.f32 0.5, %v126_v6 }
  0x24   :  { %v42_v9 = vadd.f32 0.5, %v40_v7 }
  0x25   :  { %v43_v10 = vadd.f32 0.5, %v41_v8 }
  0x26   :  { %v46_v11 = vrot.slane %v42_v9, 4  ;;  %v64_v12 = vmul.f32 %v42_v9, %v42_v9 }
  0x27   :  { %v52_v13 = vrot.slane %v43_v10, 4  ;;  %v65_v14 = vmul.f32 %v43_v10, %v43_v10 }
  0x28   :  { %v47_v15 = vadd.f32 %v46_v11, %v42_v9  ;;  %v66_v16 = vrot.slane %v64_v12, 4 }
  0x29   :  { %v53_v17 = vadd.f32 %v52_v13, %v43_v10  ;;  %v72_v18 = vrot.slane %v65_v14, 4 }
  0x2a   :  { %v48_v19 = vrot.slane %v47_v15, 2  ;;  %v67_v20 = vadd.f32 %v66_v16, %v64_v12 }
  0x2b   :  { %v54_v21 = vrot.slane %v53_v17, 2  ;;  %v73_v22 = vadd.f32 %v72_v18, %v65_v14 }
  0x2c   :  { %v49_v23 = vadd.f32 %v48_v19, %v47_v15  ;;  %v68_v24 = vrot.slane %v67_v20, 2 }
  0x2d   :  { %v55_v25 = vadd.f32 %v54_v21, %v53_v17  ;;  %v74_v26 = vrot.slane %v73_v22, 2 }
  0x2e   :  { %v50_v27 = vrot.slane %v49_v23, 1  ;;  %v69_v28 = vadd.f32 %v68_v24, %v67_v20 }
  0x2f   :  { %v56_v30 = vrot.slane %v55_v25, 1  ;;  %v75_v31 = vadd.f32 %v74_v26, %v73_v22 }
  0x30   :  { %v51_v32 = vadd.f32 %v50_v27, %v49_v23  ;;  %v70_v34 = vrot.slane %v69_v28, 1 }
  0x31   :  { %v57_v35 = vadd.f32 %v56_v30, %v55_v25  ;;  %v76_v37 = vrot.slane %v75_v31, 1 }
  0x32   :  { %v58_v38 = vadd.f32 %v51_v32, %v44_v29  ;;  %v71_v39 = vadd.f32 %v70_v34, %v69_v28 }
  0x33   :  { %v59_v41 = vadd.f32 %v57_v35, %v45_v33  ;;  %v77_v42 = vadd.f32 %v76_v37, %v75_v31 }
  0x34   :  { %60 = vst [vmem:[#allocation5] sm:$0x1] %v58_v38  ;;  %v78_v43 = vadd.f32 %v71_v39, %v62_v36 }
  0x35   :  { %61 = vst [vmem:[#allocation5 + $0x1] sm:$0x1] %v59_v41  ;;  %v79_v44 = vadd.f32 %v77_v42, %v63_v40 }
  0x36   :  { %80 = vst [vmem:[#allocation6] sm:$0x1] %v78_v43 }
  0x37   :  { %160 = shalt.err (!%p157_p12)
}
  0x38   :  { %s161_s29 = scalar_lea.hbm %s266_s1, 32 }
  0x39   :  { %p162_p13 = scmp.ne.s32.totalorder %s266_s1, %s161_s29  ;;  %p165_p0 = scmp.lt.u32.totalorder %s161_s29, %s266_s1 }
  0x3b   :  { %p167_p1 = pnand %p165_p0, %p162_p13 }
  0x3d   :  { %170 = shalt.err (!%p167_p1)
}
  0x3e   :  { %s205_s6 = smov 16   ;;  %s206_s7 = smov 1   ;;  %81 = vst [vmem:[#allocation6 + $0x1] sm:$0x1] %v79_v44 }
  0x3f   :  { %93 = dma.vmem_to_hbm [thread:$0]  %s88_s23, 32, %s266_s1, [#allocation4], %s205_s6, %s205_s6, %s206_s7  }
  0x40   :  { %s171_s10 = scalar_lea.vmem %s234_s25, 32  ;;  %p176_p3 = scmp.lt.s32.totalorder %s234_s25, %s234_s25 }
  0x41   :  { %p172_p2 = scmp.ne.s32.totalorder %s234_s25, %s171_s10  ;;  %p177_p4 = scmp.lt.s32.totalorder %s171_s10, %s171_s10 }
  0x43   :  { %p178_p5 = por %p177_p4, %p176_p3 }
  0x45   :  { %p179_p6 = pnand %p178_p5, %p172_p2 }
  0x47   :  { %182 = shalt.err (!%p179_p6)
}
  0x48   :  { %s183_s13 = scalar_lea.hbm %s267_s2, 32 }
  0x49   :  { %p184_p7 = scmp.ne.s32.totalorder %s267_s2, %s183_s13  ;;  %p187_p8 = scmp.lt.u32.totalorder %s183_s13, %s267_s2 }
  0x4b   :  { %p189_p9 = pnand %p187_p8, %p184_p7 }
  0x4d   :  { %192 = shalt.err (!%p189_p9)
}
  0x4e   :  { %105 = dma.vmem_to_hbm [thread:$0]  %s234_s25, 32, %s267_s2, [#allocation7], %s205_s6, %s205_s6, %s206_s7  }
  0x4f   :  { %195 = dma.done.wait [#allocation4], 32  }
  0x50   :  { %196 = vsyncadd [#allocation4], 4294967264 }
  0x51   :  { %197 = dma.done.wait [#allocation7], 32  }
  0x52   :  { %198 = vsyncadd [#allocation7], 4294967264 }
  0x53   :  { %112 = vsyncpa [#allocation3], 1 }
  0x54   :  { %113 = vsyncpa [#allocation4], 1 }
  0x55   :  { %114 = vsyncpa [#allocation7], 1 }

</bundles_post_ra>
